<compile_context>
chip_gen: v7x
topology: tpu7x:2x2x1
jax: 0.10.0
libtpu: 0.0.40
codegen_flags: <defaults>
</compile_context>

<pallas_src>
import jax
import jax.numpy as jnp
from jax.experimental import pallas as pl
from jax.experimental.pallas import tpu as pltpu

EPS = 1e-5

# "NT" dot: contract the last (lane) dim of both operands -> A @ B^T on the MXU
_NT_DIMS = (((1,), (1,)), ((), ()))


# ---------------------------------------------------------------------------
# Pass 1: per-N partial input moments (channel sums + Gram blocks)
# ---------------------------------------------------------------------------
def _stats_kernel(f1_ref, f2_ref, sa_ref, sb_ref, gaa_ref, gab_ref, gbb_ref):
    a = f1_ref[...]                      # (C, TS)
    b = f2_ref[...]                      # (C, TS)

    @pl.when(pl.program_id(1) == 0)
    def _():
        sa_ref[...] = jnp.zeros_like(sa_ref)
        sb_ref[...] = jnp.zeros_like(sb_ref)
        gaa_ref[...] = jnp.zeros_like(gaa_ref)
        gab_ref[...] = jnp.zeros_like(gab_ref)
        gbb_ref[...] = jnp.zeros_like(gbb_ref)

    sa_ref[...] += jnp.sum(a.astype(jnp.float32), axis=1, keepdims=True)
    sb_ref[...] += jnp.sum(b.astype(jnp.float32), axis=1, keepdims=True)
    gaa_ref[...] += jax.lax.dot_general(a, a, _NT_DIMS,
                                        preferred_element_type=jnp.float32)
    gab_ref[...] += jax.lax.dot_general(a, b, _NT_DIMS,
                                        preferred_element_type=jnp.float32)
    gbb_ref[...] += jax.lax.dot_general(b, b, _NT_DIMS,
                                        preferred_element_type=jnp.float32)


# ---------------------------------------------------------------------------
# Pass 2: conv with BN scale folded into stacked weights, add shift, store
# ---------------------------------------------------------------------------
def _apply_kernel(wa_ref, wb_ref, sh_ref, f1_ref, f2_ref, y1_ref, y2_ref):
    a = f1_ref[...]                      # (C, TS)
    b = f2_ref[...]                      # (C, TS)
    y = (jnp.dot(wa_ref[...], a, preferred_element_type=jnp.float32)
         + jnp.dot(wb_ref[...], b, preferred_element_type=jnp.float32)
         + sh_ref[...])                  # (2C, TS), shift broadcast on lanes
    c = y1_ref.shape[0]
    y1_ref[...] = y[:c].astype(y1_ref.dtype)
    y2_ref[...] = y[c:].astype(y2_ref.dtype)


# ---------------------------------------------------------------------------
# Wrapper helpers
# ---------------------------------------------------------------------------
def _round_up(x, m):
    return (x + m - 1) // m * m


def _vmem_budget_bytes():
    phys = 64 * 1024 * 1024                     # conservative fallback (= v7x)
    try:
        phys = int(pltpu.get_tpu_info().vmem_capacity_bytes)
    except Exception:
        pass
    # Leave headroom for Mosaic scratch; cap so we never ask for silly limits.
    return min(int(phys * 0.6), 96 * 1024 * 1024)


def _choose_tile(S, C, itemsize, vmem_budget, tile_spatial=None):
    s128 = _round_up(S, 128)
    if tile_spatial is not None:
        TS = max(128, _round_up(int(tile_spatial), 128))
    else:
        c_pad = _round_up(max(C, 1), 8)
        # pass 2 double-buffers 2 feature inputs + 2 outputs: ~8 tiles resident
        per_col = 8 * c_pad * itemsize
        TS = (int(vmem_budget * 0.7) // per_col // 128) * 128
        TS = max(128, min(TS, 8192))
    TS = max(128, min(TS, s128) // 128 * 128)
    S_pad = _round_up(S, TS)
    return TS, S_pad


# ---------------------------------------------------------------------------
# Forward
# ---------------------------------------------------------------------------
def nddr_forward(features, w1, w2, g1, b1, g2, b2, *, tile_spatial=None):
    """features: (f1, f2), each (N, C, D, H, W) NCDHW.
    w1, w2: squeezed 1x1x1 conv weights of shape (C, 2C) (f1 channels first).
    Returns (x1, x2), each (N, C, D, H, W)."""
    f1, f2 = features
    N, C, D, H, W = f1.shape
    assert w1.shape == (C, 2 * C) and w2.shape == (C, 2 * C)
    S = D * H * W
    dtype = f1.dtype
    itemsize = jnp.dtype(dtype).itemsize

    vmem_limit = _vmem_budget_bytes()
    TS, S_pad = _choose_tile(S, C, itemsize, vmem_limit, tile_spatial)

    f1r = f1.reshape(N, C, S)
    f2r = f2.reshape(N, C, S)
    if S_pad != S:
        # Zero columns contribute nothing to the moment sums (count uses true S)
        # and are sliced off the outputs below.
        pad = ((0, 0), (0, 0), (0, S_pad - S))
        f1r = jnp.pad(f1r, pad)
        f2r = jnp.pad(f2r, pad)

    grid = (N, S_pad // TS)

    f_spec = pl.BlockSpec((None, C, TS), lambda n, s: (n, 0, s))
    vec_out = pl.BlockSpec((None, C, 1), lambda n, s: (n, 0, 0))
    mat_out = pl.BlockSpec((None, C, C), lambda n, s: (n, 0, 0))

    # ---- pass 1: per-N partial input moments -------------------------------
    sa, sb, gaa, gab, gbb = pl.pallas_call(
        _stats_kernel,
        grid=grid,
        in_specs=[f_spec, f_spec],
        out_specs=(vec_out, vec_out, mat_out, mat_out, mat_out),
        out_shape=(jax.ShapeDtypeStruct((N, C, 1), jnp.float32),
                   jax.ShapeDtypeStruct((N, C, 1), jnp.float32),
                   jax.ShapeDtypeStruct((N, C, C), jnp.float32),
                   jax.ShapeDtypeStruct((N, C, C), jnp.float32),
                   jax.ShapeDtypeStruct((N, C, C), jnp.float32)),
        compiler_params=pltpu.CompilerParams(
            dimension_semantics=("parallel", "arbitrary"),
            vmem_limit_bytes=vmem_limit),
    )(f1r, f2r)

    # ---- fold: derive BN scale/shift from input moments (tiny XLA math) ----
    count = jnp.float32(N * S)                      # true element count
    sa_t = jnp.sum(sa[:, :, 0], axis=0)             # (C,)
    sb_t = jnp.sum(sb[:, :, 0], axis=0)             # (C,)
    Gaa = jnp.sum(gaa, axis=0)                      # (C, C)
    Gab = jnp.sum(gab, axis=0)
    Gbb = jnp.sum(gbb, axis=0)
    sx = jnp.concatenate([sa_t, sb_t])              # (2C,)
    G = jnp.concatenate(
        [jnp.concatenate([Gaa, Gab], axis=1),
         jnp.concatenate([Gab.T, Gbb], axis=1)], axis=0)   # (2C, 2C)

    def fold(w, g, beta):
        wf = w.astype(jnp.float32)                  # (C, 2C)
        mean = (wf @ sx) / count                    # (C,)
        sumsq = jnp.sum((wf @ G) * wf, axis=1)      # diag(W G W^T)
        var = jnp.maximum(sumsq / count - mean * mean, 0.0)   # biased var (BN)
        scale = g.astype(jnp.float32) * jax.lax.rsqrt(var + EPS)
        shift = beta.astype(jnp.float32) - mean * scale
        return scale, shift

    sc1, sh1 = fold(w1, g1, b1)
    sc2, sh2 = fold(w2, g2, b2)

    # Fold scale into the conv weights and stack the two branches: (2C, C).
    w1s = w1.astype(jnp.float32) * sc1[:, None]
    w2s = w2.astype(jnp.float32) * sc2[:, None]
    Wa = jnp.concatenate([w1s[:, :C], w2s[:, :C]], axis=0).astype(dtype)
    Wb = jnp.concatenate([w1s[:, C:], w2s[:, C:]], axis=0).astype(dtype)
    sh = jnp.concatenate([sh1, sh2])[:, None]                       # (2C, 1) f32

    wmat_spec = pl.BlockSpec((2 * C, C), lambda n, s: (0, 0))       # resident
    sh_spec = pl.BlockSpec((2 * C, 1), lambda n, s: (0, 0))

    # ---- pass 2: conv + folded BN, lane-dense stores, fully parallel grid --
    y_shape = jax.ShapeDtypeStruct((N, C, S_pad), dtype)
    y1r, y2r = pl.pallas_call(
        _apply_kernel,
        grid=grid,
        in_specs=[wmat_spec, wmat_spec, sh_spec, f_spec, f_spec],
        out_specs=(f_spec, f_spec),
        out_shape=(y_shape, y_shape),
        compiler_params=pltpu.CompilerParams(
            dimension_semantics=("parallel", "parallel"),
            vmem_limit_bytes=vmem_limit),
    )(Wa, Wb, sh, f1r, f2r)

    if S_pad != S:
        y1r = y1r[..., :S]
        y2r = y2r[..., :S]
    return (y1r.reshape(N, C, D, H, W), y2r.reshape(N, C, D, H, W))


# ---------------------------------------------------------------------------
# Reference + test
# ---------------------------------------------------------------------------
def make_diagonal_weight(out_channels, init_weights, dtype=jnp.float32):
    # matches: torch.cat([eye(C)*w0, eye(C)*w1], dim=1) -> (C, 2C)
    eye = jnp.eye(out_channels, dtype=dtype)
    return jnp.concatenate([eye * init_weights[0], eye * init_weights[1]], axis=1)


def reference_forward(features, w1, w2, g1, b1, g2, b2):
    x = jnp.concatenate(features, axis=1)                       # (N, 2C, D, H, W)
    y1 = jnp.einsum('ncdhw,oc->nodhw', x, w1)
    y2 = jnp.einsum('ncdhw,oc->nodhw', x, w2)

    def bn(y, g, b):
        mean = jnp.mean(y, axis=(0, 2, 3, 4), keepdims=True)
        var = jnp.mean((y - mean) ** 2, axis=(0, 2, 3, 4), keepdims=True)
        return (y - mean) * jax.lax.rsqrt(var + EPS) * g.reshape(1, -1, 1, 1, 1) \
               + b.reshape(1, -1, 1, 1, 1)

    return bn(y1, g1, b1), bn(y2, g2, b2)


if __name__ == "__main__":
    key = jax.random.PRNGKey(0)
    ks = jax.random.split(key, 8)

    # Case 1: multi-tile grid -> exercises cross-tile / cross-N stat merging.
    N, C, D, H, W = 2, 4, 8, 8, 16          # out_channels = 4, S = 1024
    f1 = jax.random.normal(ks[0], (N, C, D, H, W), dtype=jnp.float32)
    f2 = jax.random.normal(ks[1], (N, C, D, H, W), dtype=jnp.float32)

    # 'diagonal' init (init_weights = [0.9, 0.1]) + perturbation so both
    # branches and all channels are exercised non-trivially.
    w1 = make_diagonal_weight(C, (0.9, 0.1)) + 0.05 * jax.random.normal(ks[2], (C, 2 * C))
    w2 = make_diagonal_weight(C, (0.9, 0.1)) + 0.05 * jax.random.normal(ks[3], (C, 2 * C))
    g1 = 1.0 + 0.1 * jax.random.normal(ks[4], (C,))
    b1 = 0.1 * jax.random.normal(ks[5], (C,))
    g2 = 1.0 + 0.1 * jax.random.normal(ks[6], (C,))
    b2 = 0.1 * jax.random.normal(ks[7], (C,))

    x1, x2 = nddr_forward((f1, f2), w1, w2, g1, b1, g2, b2, tile_spatial=256)
    jax.block_until_ready((x1, x2))
    r1, r2 = reference_forward((f1, f2), w1, w2, g1, b1, g2, b2)
    assert x1.shape == (N, C, D, H, W) and x2.shape == (N, C, D, H, W)
    assert jnp.allclose(x1, r1, atol=1e-3, rtol=1e-3), float(jnp.max(jnp.abs(x1 - r1)))
    assert jnp.allclose(x2, r2, atol=1e-3, rtol=1e-3), float(jnp.max(jnp.abs(x2 - r2)))

    # Case 2: S not a multiple of 128 -> exercises pad/slice path + auto tile.
    N2, D2, H2, W2 = 1, 3, 5, 7             # S = 105
    f1b = jax.random.normal(jax.random.PRNGKey(1), (N2, C, D2, H2, W2), jnp.float32)
    f2b = jax.random.normal(jax.random.PRNGKey(2), (N2, C, D2, H2, W2), jnp.float32)
    x1b, x2b = nddr_forward((f1b, f2b), w1, w2, g1, b1, g2, b2)
    jax.block_until_ready((x1b, x2b))
    r1b, r2b = reference_forward((f1b, f2b), w1, w2, g1, b1, g2, b2)
    assert jnp.allclose(x1b, r1b, atol=1e-3, rtol=1e-3), float(jnp.max(jnp.abs(x1b - r1b)))
    assert jnp.allclose(x2b, r2b, atol=1e-3, rtol=1e-3), float(jnp.max(jnp.abs(x2b - r2b)))

    print("KERNEL_OK")
</pallas_src>

<mosaic_0001>
module attributes {stable_mosaic.version = 11 : i64} {
  func.func @_stats_kernel(%arg0: i32, %arg1: i32, %arg2: memref<1x4x256xf32, #tpu.memory_space<vmem>>, %arg3: memref<1x4x256xf32, #tpu.memory_space<vmem>>, %arg4: memref<1x4x1xf32, #tpu.memory_space<vmem>>, %arg5: memref<1x4x1xf32, #tpu.memory_space<vmem>>, %arg6: memref<1x4x4xf32, #tpu.memory_space<vmem>>, %arg7: memref<1x4x4xf32, #tpu.memory_space<vmem>>, %arg8: memref<1x4x4xf32, #tpu.memory_space<vmem>>) attributes {dimension_semantics = [#tpu.dimension_semantics<parallel>, #tpu.dimension_semantics<arbitrary>], iteration_bounds = array<i64: 2, 4>, scalar_prefetch = 0 : i64, scratch_operands = 0 : i64, tpu.core_type = #tpu.core_type<tc>, window_params = [{transform_indices = @transform_0, window_bounds = array<i64: 1, 4, 256>}, {transform_indices = @transform_1, window_bounds = array<i64: 1, 4, 256>}, {transform_indices = @transform_2, window_bounds = array<i64: 1, 4, 1>}, {transform_indices = @transform_3, window_bounds = array<i64: 1, 4, 1>}, {transform_indices = @transform_4, window_bounds = array<i64: 1, 4, 4>}, {transform_indices = @transform_5, window_bounds = array<i64: 1, 4, 4>}, {transform_indices = @transform_6, window_bounds = array<i64: 1, 4, 4>}]} {
    %c0 = arith.constant 0 : index
    %c0_0 = arith.constant 0 : index
    %c0_1 = arith.constant 0 : index
    %0 = vector.load %arg2[%c0, %c0_0, %c0_1] : memref<1x4x256xf32, #tpu.memory_space<vmem>>, vector<1x4x256xf32>
    %1 = vector.shape_cast %0 : vector<1x4x256xf32> to vector<4x256xf32>
    %c0_2 = arith.constant 0 : index
    %c0_3 = arith.constant 0 : index
    %c0_4 = arith.constant 0 : index
    %2 = vector.load %arg3[%c0_2, %c0_3, %c0_4] : memref<1x4x256xf32, #tpu.memory_space<vmem>>, vector<1x4x256xf32>
    %3 = vector.shape_cast %2 : vector<1x4x256xf32> to vector<4x256xf32>
    %c0_i32 = arith.constant 0 : i32
    %4 = arith.cmpi eq, %arg1, %c0_i32 : i32
    %5 = arith.extui %4 : i1 to i32
    %c0_i32_5 = arith.constant 0 : i32
    %6 = arith.cmpi ne, %5, %c0_i32_5 : i32
    scf.if %6 {
      %cst_40 = arith.constant 0.000000e+00 : f32
      %44 = vector.broadcast %cst_40 : f32 to vector<4x1xf32>
      %c0_41 = arith.constant 0 : index
      %c0_42 = arith.constant 0 : index
      %c0_43 = arith.constant 0 : index
      %45 = vector.load %arg4[%c0_41, %c0_42, %c0_43] : memref<1x4x1xf32, #tpu.memory_space<vmem>>, vector<1x4x1xf32>
      %46 = vector.shape_cast %45 : vector<1x4x1xf32> to vector<4x1xf32>
      %47 = vector.shape_cast %44 : vector<4x1xf32> to vector<1x4x1xf32>
      tpu.vector_store %arg4[%c0_41, %c0_42, %c0_43], %47 {strides = array<i32>} : memref<1x4x1xf32, #tpu.memory_space<vmem>>, vector<1x4x1xf32>,
      %cst_44 = arith.constant 0.000000e+00 : f32
      %48 = vector.broadcast %cst_44 : f32 to vector<4x1xf32>
      %c0_45 = arith.constant 0 : index
      %c0_46 = arith.constant 0 : index
      %c0_47 = arith.constant 0 : index
      %49 = vector.load %arg5[%c0_45, %c0_46, %c0_47] : memref<1x4x1xf32, #tpu.memory_space<vmem>>, vector<1x4x1xf32>
      %50 = vector.shape_cast %49 : vector<1x4x1xf32> to vector<4x1xf32>
      %51 = vector.shape_cast %48 : vector<4x1xf32> to vector<1x4x1xf32>
      tpu.vector_store %arg5[%c0_45, %c0_46, %c0_47], %51 {strides = array<i32>} : memref<1x4x1xf32, #tpu.memory_space<vmem>>, vector<1x4x1xf32>,
      %cst_48 = arith.constant 0.000000e+00 : f32
      %52 = vector.broadcast %cst_48 : f32 to vector<4x4xf32>
      %c0_49 = arith.constant 0 : index
      %c0_50 = arith.constant 0 : index
      %c0_51 = arith.constant 0 : index
      %53 = vector.load %arg6[%c0_49, %c0_50, %c0_51] : memref<1x4x4xf32, #tpu.memory_space<vmem>>, vector<1x4x4xf32>
      %54 = vector.shape_cast %53 : vector<1x4x4xf32> to vector<4x4xf32>
      %55 = vector.shape_cast %52 : vector<4x4xf32> to vector<1x4x4xf32>
      tpu.vector_store %arg6[%c0_49, %c0_50, %c0_51], %55 {strides = array<i32>} : memref<1x4x4xf32, #tpu.memory_space<vmem>>, vector<1x4x4xf32>,
      %cst_52 = arith.constant 0.000000e+00 : f32
      %56 = vector.broadcast %cst_52 : f32 to vector<4x4xf32>
      %c0_53 = arith.constant 0 : index
      %c0_54 = arith.constant 0 : index
      %c0_55 = arith.constant 0 : index
      %57 = vector.load %arg7[%c0_53, %c0_54, %c0_55] : memref<1x4x4xf32, #tpu.memory_space<vmem>>, vector<1x4x4xf32>
      %58 = vector.shape_cast %57 : vector<1x4x4xf32> to vector<4x4xf32>
      %59 = vector.shape_cast %56 : vector<4x4xf32> to vector<1x4x4xf32>
      tpu.vector_store %arg7[%c0_53, %c0_54, %c0_55], %59 {strides = array<i32>} : memref<1x4x4xf32, #tpu.memory_space<vmem>>, vector<1x4x4xf32>,
      %cst_56 = arith.constant 0.000000e+00 : f32
      %60 = vector.broadcast %cst_56 : f32 to vector<4x4xf32>
      %c0_57 = arith.constant 0 : index
      %c0_58 = arith.constant 0 : index
      %c0_59 = arith.constant 0 : index
      %61 = vector.load %arg8[%c0_57, %c0_58, %c0_59] : memref<1x4x4xf32, #tpu.memory_space<vmem>>, vector<1x4x4xf32>
      %62 = vector.shape_cast %61 : vector<1x4x4xf32> to vector<4x4xf32>
      %63 = vector.shape_cast %60 : vector<4x4xf32> to vector<1x4x4xf32>
      tpu.vector_store %arg8[%c0_57, %c0_58, %c0_59], %63 {strides = array<i32>} : memref<1x4x4xf32, #tpu.memory_space<vmem>>, vector<1x4x4xf32>,
    } else {
    }
    %c0_6 = arith.constant 0 : index
    %c0_7 = arith.constant 0 : index
    %c0_8 = arith.constant 0 : index
    %7 = vector.load %arg4[%c0_6, %c0_7, %c0_8] : memref<1x4x1xf32, #tpu.memory_space<vmem>>, vector<1x4x1xf32>
    %8 = vector.shape_cast %7 : vector<1x4x1xf32> to vector<4x1xf32>
    %cst = arith.constant dense<0.000000e+00> : vector<4xf32>
    %9 = vector.multi_reduction <add>, %1, %cst [1] : vector<4x256xf32> to vector<4xf32>
    %10 = vector.shape_cast %9 : vector<4xf32> to vector<4x1xf32>
    %11 = arith.addf %8, %10 : vector<4x1xf32>
    %c0_9 = arith.constant 0 : index
    %c0_10 = arith.constant 0 : index
    %c0_11 = arith.constant 0 : index
    %12 = vector.load %arg4[%c0_9, %c0_10, %c0_11] : memref<1x4x1xf32, #tpu.memory_space<vmem>>, vector<1x4x1xf32>
    %13 = vector.shape_cast %12 : vector<1x4x1xf32> to vector<4x1xf32>
    %14 = vector.shape_cast %11 : vector<4x1xf32> to vector<1x4x1xf32>
    tpu.vector_store %arg4[%c0_9, %c0_10, %c0_11], %14 {strides = array<i32>} : memref<1x4x1xf32, #tpu.memory_space<vmem>>, vector<1x4x1xf32>,
    %c0_12 = arith.constant 0 : index
    %c0_13 = arith.constant 0 : index
    %c0_14 = arith.constant 0 : index
    %15 = vector.load %arg5[%c0_12, %c0_13, %c0_14] : memref<1x4x1xf32, #tpu.memory_space<vmem>>, vector<1x4x1xf32>
    %16 = vector.shape_cast %15 : vector<1x4x1xf32> to vector<4x1xf32>
    %cst_15 = arith.constant dense<0.000000e+00> : vector<4xf32>
    %17 = vector.multi_reduction <add>, %3, %cst_15 [1] : vector<4x256xf32> to vector<4xf32>
    %18 = vector.shape_cast %17 : vector<4xf32> to vector<4x1xf32>
    %19 = arith.addf %16, %18 : vector<4x1xf32>
    %c0_16 = arith.constant 0 : index
    %c0_17 = arith.constant 0 : index
    %c0_18 = arith.constant 0 : index
    %20 = vector.load %arg5[%c0_16, %c0_17, %c0_18] : memref<1x4x1xf32, #tpu.memory_space<vmem>>, vector<1x4x1xf32>
    %21 = vector.shape_cast %20 : vector<1x4x1xf32> to vector<4x1xf32>
    %22 = vector.shape_cast %19 : vector<4x1xf32> to vector<1x4x1xf32>
    tpu.vector_store %arg5[%c0_16, %c0_17, %c0_18], %22 {strides = array<i32>} : memref<1x4x1xf32, #tpu.memory_space<vmem>>, vector<1x4x1xf32>,
    %c0_19 = arith.constant 0 : index
    %c0_20 = arith.constant 0 : index
    %c0_21 = arith.constant 0 : index
    %23 = vector.load %arg6[%c0_19, %c0_20, %c0_21] : memref<1x4x4xf32, #tpu.memory_space<vmem>>, vector<1x4x4xf32>
    %24 = vector.shape_cast %23 : vector<1x4x4xf32> to vector<4x4xf32>
    %cst_22 = arith.constant dense<0.000000e+00> : vector<4x4xf32>
    %25 = tpu.matmul %1, %1, %cst_22 {dimension_numbers = #tpu.dot_dimension_numbers<[1], [1], [0], [0], [0, 0, 1, 0], [], []>} : vector<4x256xf32>, vector<4x256xf32>, vector<4x4xf32> -> vector<4x4xf32>
    %26 = arith.addf %24, %25 : vector<4x4xf32>
    %c0_23 = arith.constant 0 : index
    %c0_24 = arith.constant 0 : index
    %c0_25 = arith.constant 0 : index
    %27 = vector.load %arg6[%c0_23, %c0_24, %c0_25] : memref<1x4x4xf32, #tpu.memory_space<vmem>>, vector<1x4x4xf32>
    %28 = vector.shape_cast %27 : vector<1x4x4xf32> to vector<4x4xf32>
    %29 = vector.shape_cast %26 : vector<4x4xf32> to vector<1x4x4xf32>
    tpu.vector_store %arg6[%c0_23, %c0_24, %c0_25], %29 {strides = array<i32>} : memref<1x4x4xf32, #tpu.memory_space<vmem>>, vector<1x4x4xf32>,
    %c0_26 = arith.constant 0 : index
    %c0_27 = arith.constant 0 : index
    %c0_28 = arith.constant 0 : index
    %30 = vector.load %arg7[%c0_26, %c0_27, %c0_28] : memref<1x4x4xf32, #tpu.memory_space<vmem>>, vector<1x4x4xf32>
    %31 = vector.shape_cast %30 : vector<1x4x4xf32> to vector<4x4xf32>
    %cst_29 = arith.constant dense<0.000000e+00> : vector<4x4xf32>
    %32 = tpu.matmul %1, %3, %cst_29 {dimension_numbers = #tpu.dot_dimension_numbers<[1], [1], [0], [0], [0, 0, 1, 0], [], []>} : vector<4x256xf32>, vector<4x256xf32>, vector<4x4xf32> -> vector<4x4xf32>
    %33 = arith.addf %31, %32 : vector<4x4xf32>
    %c0_30 = arith.constant 0 : index
    %c0_31 = arith.constant 0 : index
    %c0_32 = arith.constant 0 : index
    %34 = vector.load %arg7[%c0_30, %c0_31, %c0_32] : memref<1x4x4xf32, #tpu.memory_space<vmem>>, vector<1x4x4xf32>
    %35 = vector.shape_cast %34 : vector<1x4x4xf32> to vector<4x4xf32>
    %36 = vector.shape_cast %33 : vector<4x4xf32> to vector<1x4x4xf32>
    tpu.vector_store %arg7[%c0_30, %c0_31, %c0_32], %36 {strides = array<i32>} : memref<1x4x4xf32, #tpu.memory_space<vmem>>, vector<1x4x4xf32>,
    %c0_33 = arith.constant 0 : index
    %c0_34 = arith.constant 0 : index
    %c0_35 = arith.constant 0 : index
    %37 = vector.load %arg8[%c0_33, %c0_34, %c0_35] : memref<1x4x4xf32, #tpu.memory_space<vmem>>, vector<1x4x4xf32>
    %38 = vector.shape_cast %37 : vector<1x4x4xf32> to vector<4x4xf32>
    %cst_36 = arith.constant dense<0.000000e+00> : vector<4x4xf32>
    %39 = tpu.matmul %3, %3, %cst_36 {dimension_numbers = #tpu.dot_dimension_numbers<[1], [1], [0], [0], [0, 0, 1, 0], [], []>} : vector<4x256xf32>, vector<4x256xf32>, vector<4x4xf32> -> vector<4x4xf32>
    %40 = arith.addf %38, %39 : vector<4x4xf32>
    %c0_37 = arith.constant 0 : index
    %c0_38 = arith.constant 0 : index
    %c0_39 = arith.constant 0 : index
    %41 = vector.load %arg8[%c0_37, %c0_38, %c0_39] : memref<1x4x4xf32, #tpu.memory_space<vmem>>, vector<1x4x4xf32>
    %42 = vector.shape_cast %41 : vector<1x4x4xf32> to vector<4x4xf32>
    %43 = vector.shape_cast %40 : vector<4x4xf32> to vector<1x4x4xf32>
    tpu.vector_store %arg8[%c0_37, %c0_38, %c0_39], %43 {strides = array<i32>} : memref<1x4x4xf32, #tpu.memory_space<vmem>>, vector<1x4x4xf32>,
    return
  }
  func.func @transform_0(%arg0: i32, %arg1: i32) -> (i32, i32, i32) {
    %c0_i32 = arith.constant 0 : i32
    %c0_i32_0 = arith.constant 0 : i32
    return %arg0, %c0_i32, %arg1 : i32, i32, i32
  }
  func.func @transform_1(%arg0: i32, %arg1: i32) -> (i32, i32, i32) {
    %c0_i32 = arith.constant 0 : i32
    %c0_i32_0 = arith.constant 0 : i32
    return %arg0, %c0_i32, %arg1 : i32, i32, i32
  }
  func.func @transform_2(%arg0: i32, %arg1: i32) -> (i32, i32, i32) {
    %c0_i32 = arith.constant 0 : i32
    %c0_i32_0 = arith.constant 0 : i32
    %c0_i32_1 = arith.constant 0 : i32
    return %arg0, %c0_i32, %c0_i32_0 : i32, i32, i32
  }
  func.func @transform_3(%arg0: i32, %arg1: i32) -> (i32, i32, i32) {
    %c0_i32 = arith.constant 0 : i32
    %c0_i32_0 = arith.constant 0 : i32
    %c0_i32_1 = arith.constant 0 : i32
    return %arg0, %c0_i32, %c0_i32_0 : i32, i32, i32
  }
  func.func @transform_4(%arg0: i32, %arg1: i32) -> (i32, i32, i32) {
    %c0_i32 = arith.constant 0 : i32
    %c0_i32_0 = arith.constant 0 : i32
    %c0_i32_1 = arith.constant 0 : i32
    return %arg0, %c0_i32, %c0_i32_0 : i32, i32, i32
  }
  func.func @transform_5(%arg0: i32, %arg1: i32) -> (i32, i32, i32) {
    %c0_i32 = arith.constant 0 : i32
    %c0_i32_0 = arith.constant 0 : i32
    %c0_i32_1 = arith.constant 0 : i32
    return %arg0, %c0_i32, %c0_i32_0 : i32, i32, i32
  }
  func.func @transform_6(%arg0: i32, %arg1: i32) -> (i32, i32, i32) {
    %c0_i32 = arith.constant 0 : i32
    %c0_i32_0 = arith.constant 0 : i32
    %c0_i32_1 = arith.constant 0 : i32
    return %arg0, %c0_i32, %c0_i32_0 : i32, i32, i32
  }
}

</mosaic_0001>

<bundles_post_ra>
// kernel: tpu_custom_call.1
= control target key start
LH: loop header
LB: loop body
LE: loop exit
PB: predicated region body
PF: predicated region fallthrough
CT: control target
= control target key end

     0   :  { %s1725_s0 = inlined_call_operand.hbm [shape: f32[2,4,1024], index: 0, kind: input, shape index: {}]   ;;  %s1726_s1 = inlined_call_operand.hbm [shape: f32[2,4,1024], index: 1, kind: input, shape index: {}]   ;;  %s1727_s2 = inlined_call_operand.vmem [shape: f32[2,4,1], index: 2, kind: output, shape index: {0}]   ;;  %s1728_s3 = inlined_call_operand.vmem [shape: f32[2,4,1], index: 3, kind: output, shape index: {1}]   ;;  %s1729_s4 = inlined_call_operand.hbm [shape: f32[2,4,4], index: 4, kind: output, shape index: {2}]   ;;  %s1730_s5 = inlined_call_operand.hbm [shape: f32[2,4,4], index: 5, kind: output, shape index: {3}]   ;;  %s1731_s6 = inlined_call_operand.hbm [shape: f32[2,4,4], index: 6, kind: output, shape index: {4}]  }
   0x1   :  { %1742 = sst [smem:[#allocation22_spill]] %s1725_s0 }
   0x2   :  { %12 = vsyncpa [#allocation3], 0 }
   0x3   :  { %14 = vsyncpa [#allocation3 + $0x1], 0 }
   0x4   :  { %15 = vsyncpa [#allocation6], 0 }
   0x5   :  { %17 = vsyncpa [#allocation6 + $0x1], 0 }
   0x6   :  { %18 = vsyncpa [#allocation4], 0 }
   0x7   :  { %20 = vsyncpa [#allocation4 + $0x1], 0 }
   0x8   :  { %21 = vsyncpa [#allocation9], 0 }
   0x9   :  { %23 = vsyncpa [#allocation9 + $0x1], 0  ;;  %s1342_s21 = smov 0   ;;  %s1344_s22 = smov 0  }
   0xa   :  { %s1346_s23 = smov 0   ;;  %s1348_s24 = smov 0  }
   0xb   :  { %s1350_s25 = smov 0   ;;  %s1352_s26 = smov 0  }
   0xc   :  { %s1354_s27 = smov 0   ;;  %s1356_s28 = smov 0  }
   0xd   :  { %s1358_s29 = smov 0   ;;  %s1360_s30 = smov 0  }
   0xe   :  { %s1362_s7 = smov 0  }
   0xf LB: > { %1743 = sst [smem:[#allocation15_spill]] %s1267_s23  ;;  %s1396_s8 = sadd.s32 4294967295, %s1299_s7   ;;  %s1299_s7 = sphi %s1362_s7, %s29_s7   ;;  %s1295_s30 = sphi %s1360_s30, %s1773_s30   ;;  %s1291_s29 = sphi %s1358_s29, %s1779_s29   ;;  %s1287_s28 = sphi %s1356_s28, %s1771_s28   ;;  %s1283_s27 = sphi %s1354_s27, %s1778_s27   ;;  %s1279_s26 = sphi %s1352_s26, %s1770_s26   ;;  %s1275_s25 = sphi %s1350_s25, %s1777_s25   ;;  %s1271_s24 = sphi %s1348_s24, %s1776_s24   ;;  %s1267_s23 = sphi %s1346_s23, %s1768_s23   ;;  %s1263_s22 = sphi %s1344_s22, %s1775_s22   ;;  %s1259_s21 = sphi %s1342_s21, %s1774_s21  }
  0x10   : > { %1744 = sst [smem:[#allocation16_spill]] %s1279_s26  ;;  %s1734_s9 = sadd.s32 4294967294, %s1299_s7  }
  0x11   : > { %1745 = sst [smem:[#allocation17_spill]] %s1295_s30  ;;  %s38_s10 = sadd.s32 1, %s1291_s29 }
  0x12   : > { %s41_s11 = sadd.s32 1, %s1295_s30  ;;  %p39_p0 = scmp.ge.s32.totalorder %s38_s10, 4 }
  0x13   : > { %s50_s12 = sadd.s32 1, %s1279_s26  ;;  %p57_p1 = scmp.ne.s32.totalorder %s1279_s26, %s1275_s25 }
  0x14   : > { %p58_p2 = scmp.eq.s32.totalorder %s1299_s7, 0  ;;  %s1781_s10 = smov (%p39_p0, %s38_s10), 0 }
  0x15   : > { %1746 = sst [smem:[#allocation18_spill]] %s1781_s10  ;;  %s1783_s11 = smov (!%p39_p0, %s41_s11), %s1295_s30 }
  0x16   : > { %s46_s13 = ssub.s32 %s1291_s29, %s1781_s10  ;;  %p1410_p3 = por %p58_p2, %p57_p1 }
  0x17   : > { %p43_p4 = scmp.ge.s32.totalorder %s1783_s11, 2  ;;  %p63_p5 = scmp.ne.s32.totalorder %s1275_s25, %s1271_s24 }
  0x18   : > { %p64_p6 = scmp.eq.s32.totalorder %s1396_s8, 0  ;;  %s156_s15 = sadd.s32 1, %s1267_s23 }
  0x19   : > { %s1785_s11 = smov (%p43_p4, %s1783_s11), 0  ;;  %p166_p8 = scmp.ne.s32.totalorder %s1267_s23, %s1263_s22 }
  0x1a   : > { %1748 = sst [smem:[#allocation19_spill]] %s1785_s11  ;;  %p1419_p7 = por %p64_p6, %p63_p5 }
  0x1b   : > { %s45_s17 = ssub.s32 %s1295_s30, %s1785_s11  ;;  %p167_p9 = scmp.eq.s32.totalorder %s1396_s8, 7 }
  0x1c   : > { %s1749_s16 = scalar_select %p1419_p7, 1, 0 }
  0x1d   : > { %s47_s18 = sor.u32 %s46_s13, %s45_s17  ;;  %p154_p10 = scmp.eq.s32.totalorder %s45_s17, 0 }
  0x1e   : > { %p48_p11 = scmp.eq.s32.totalorder %s47_s18, 0  ;;  %p1428_p12 = por %p167_p9, %p166_p8 }
  0x1f   : > { %s1433_s20 = scalar_select %p154_p10, %s1267_s23, %s156_s15  }
  0x20   : > { %s1750_s19 = scalar_select %p1428_p12, 1, 0 }
  0x21   : > { %1751 = sst [smem:[#allocation20_spill]] %s1433_s20  ;;  %p172_p13 = scmp.ne.s32.totalorder %s1263_s22, %s1259_s21 }
  0x22   : > { %s1436_s24 = scalar_select %p48_p11, %s1279_s26, %s50_s12  }
  0x23   : > { %p173_p0 = scmp.eq.s32.totalorder %s1734_s9, 7  ;;  %p962_p1 = scmp.lt.s32.totalorder %s1299_s7, 8 }
  0x24   : > { %1752 = sst [smem:[#allocation21_spill]] %s1436_s24  ;;  %s1448_s13 = sand.u32 1, %s1279_s26  }
  0x25   : > { %p1443_p2 = por %p173_p0, %p172_p13  ;;  %s1737_s17 = sshll.u32 %s1448_s13, 3 }
  0x26   : > { %s911_s15 = sshll.u32 %s1291_s29, 1  ;;  %s912_s18 = sshll.u32 %s1295_s30, 3 }
  0x27   : > { %s1753_s11 = scalar_select %p1443_p2, 1, 0 }
  0x28   : > { %s249_s12 = scalar_lea.vmem [#allocation2], %s1737_s17  ;;  %s1455_s24 = sadd.s32 %s912_s18, %s911_s15 }
  0x29   : > { %s259_s10 = sshll.u32 %s249_s12, 4  ;;  %s1738_s9 = sshll.u32 %s1455_s24, 6  ;;  %s1457_s10 = int_to_ptr.vmem [resolvable:$true] %s259_s10 }
  0x2a   : > { %p1462_p4 = pnand %p962_p1, %p1410_p3  ;;  %s1755_s0 = sld [smem:[#allocation22_spill]] }
  0x2b   : > { %s246_s15 = scalar_lea.sflag [#allocation3], %s1448_s13 }
  0x2c   : > { %p1055_p8 = pneg %p1462_p4 }
  0x30   : > { %s1471_s17 = scalar_lea.hbm %s1755_s0, %s1738_s9  ;;  %s1058_s18 = scalar_lea.hbm %s1755_s0, 1024 }
  0x31   : > { %s1053_s14 = scalar_lea.hbm %s1471_s17, 128  ;;  %p1059_p11 = scmp.lt.u32.totalorder %s1471_s17, %s1755_s0 }
  0x32   : > { %p1054_p3 = scmp.ne.s32.totalorder %s1471_s17, %s1053_s14  ;;  %p1060_p13 = scmp.lt.u32.totalorder %s1058_s18, %s1053_s14 }
  0x33   : > { %p1062_p1 = scmp.lt.u32.totalorder %s1053_s14, %s1471_s17 }
  0x34   : > { %p1056_p9 = pnand %p1055_p8, %p1054_p3  ;;  %p1061_p0 = por %p1060_p13, %p1059_p11 }
  0x36   : > { %p1057_p10 = pneg %p1056_p9  ;;  %p1063_p5 = por %p1062_p1, %p1061_p0 }
  0x38   : > { %p1064_p6 = pnand %p1063_p5, %p1057_p10 }
  0x3a   : > { %1067 = shalt.err (!%p1064_p6)
}
  0x3b   : > { %s1068_s30 = scalar_lea.vmem %s1457_s10, 128  ;;  %s1301_s23 = smov [#allocation2]  }
  0x3c   : > { %p1069_p3 = scmp.ne.s32.totalorder %s1457_s10, %s1068_s30  ;;  %s1073_s20 = sshll.u32 %s1301_s23, 4  ;;  %s1074_s20 = int_to_ptr.vmem [resolvable:$false] %s1073_s20 }
  0x3d   : > { %s1075_s9 = scalar_lea.vmem %s1074_s20, 256  ;;  %p1076_p12 = scmp.lt.s32.totalorder %s1457_s10, %s1074_s20 }
  0x3e   : > { %p1071_p9 = pnand %p1069_p3, %p1055_p8  ;;  %p1077_p11 = scmp.lt.s32.totalorder %s1075_s9, %s1068_s30 }
  0x40   : > { %p1072_p2 = pneg %p1071_p9  ;;  %p1078_p13 = por %p1077_p11, %p1076_p12 }
  0x42   : > { %p1079_p0 = pnand %p1078_p13, %p1072_p2 }
  0x44   : > { %1082 = shalt.err (!%p1079_p0)
}
  0x45   : > { %948 = dma.hbm_to_vmem [thread:$0]  (!%p1462_p4), %s1471_s17, 128, %s1457_s10, %s246_s15  }
  0x46   : > { %p1756_p5 = scmp.lt.s32.totalorder %s1299_s7, 9  ;;  %p1757_p6 = scmp.ge.s32.totalorder %s1299_s7, 1 }
  0x47   : > { %s1759_s30 = sshll.u32 %s1455_s24, 6  ;;  %s1760_s20 = sshll.u32 %s1448_s13, 3 }
  0x48   : > { %p1505_p10 = pnand %p1757_p6, %p1756_p5  ;;  %s1514_s23 = scalar_lea.hbm %s1726_s1, %s1759_s30 }
  0x49   : > { %s270_s9 = scalar_lea.vmem [#allocation5], %s1760_s20  ;;  %s267_s10 = scalar_lea.sflag [#allocation6], %s1448_s13 }
  0x4a   : > { %s1758_s14 = scalar_select %p1505_p10, 1, 0 }
  0x4b   : > { %s280_s0 = sshll.u32 %s270_s9, 4  ;;  %s1083_s17 = scalar_lea.hbm %s1514_s23, 128  ;;  %s281_s0 = int_to_ptr.vmem [resolvable:$true] %s280_s0 }
  0x4c   : > { %p1084_p12 = scmp.ne.s32.totalorder %s1514_s23, %s1083_s17  ;;  %s1088_s30 = scalar_lea.hbm %s1726_s1, 1024 }
  0x4d   : > { %p1089_p3 = scmp.lt.u32.totalorder %s1514_s23, %s1726_s1  ;;  %p1090_p9 = scmp.lt.u32.totalorder %s1088_s30, %s1083_s17 }
  0x4e   : > { %p1086_p2 = pnand %p1084_p12, %p1055_p8  ;;  %p1092_p13 = scmp.lt.u32.totalorder %s1083_s17, %s1514_s23 }
  0x4f   : > { %p1091_p11 = por %p1090_p9, %p1089_p3 }
  0x50   : > { %p1087_p1 = pneg %p1086_p2 }
  0x51   : > { %p1093_p0 = por %p1092_p13, %p1091_p11 }
  0x53   : > { %p1094_p5 = pnand %p1093_p0, %p1087_p1 }
  0x55   : > { %1097 = shalt.err (!%p1094_p5)
}
  0x56   : > { %s1098_s13 = scalar_lea.vmem %s281_s0, 128  ;;  %s1302_s20 = smov [#allocation5]  }
  0x57   : > { %p1099_p6 = scmp.ne.s32.totalorder %s281_s0, %s1098_s13  ;;  %s1103_s9 = sshll.u32 %s1302_s20, 4  ;;  %s1104_s9 = int_to_ptr.vmem [resolvable:$false] %s1103_s9 }
  0x58   : > { %s1105_s24 = scalar_lea.vmem %s1104_s9, 256  ;;  %p1106_p7 = scmp.lt.s32.totalorder %s281_s0, %s1104_s9 }
  0x59   : > { %p1101_p12 = pnand %p1099_p6, %p1055_p8  ;;  %p1107_p10 = scmp.lt.s32.totalorder %s1105_s24, %s1098_s13 }
  0x5b   : > { %p1102_p2 = pneg %p1101_p12  ;;  %p1108_p3 = por %p1107_p10, %p1106_p7 }
  0x5d   : > { %p1109_p9 = pnand %p1108_p3, %p1102_p2 }
  0x5f   : > { %1112 = shalt.err (!%p1109_p9)
}
  0x60   : > { %951 = dma.hbm_to_vmem [thread:$0]  (!%p1462_p4), %s1514_s23, 128, %s281_s0, %s267_s10  }
  0x61   : > { %p1761_p1 = scmp.ne.s32.totalorder %s1758_s14, 0 }
  0x62   : > { %s291_s17 = sand.u32 (!%p1761_p1), 1, %s1275_s25   ;;  %p1762_p8 = scmp.ne.s32.totalorder (!%p1761_p1), %s1749_s16, 0 }
  0x63   : > { %289 = sbr.rel (%p1761_p1) target bundleno = 408 (0x198), region = 28  ;;  %s919_s15 = sshll.u32 (!%p1761_p1), %s291_s17, 3 }
  0x64   : > { %s292_s30 = scalar_lea.sflag (!%p1761_p1), [#allocation3], %s291_s17  ;;  %s295_s18 = scalar_lea.vmem (!%p1761_p1), [#allocation2], %s919_s15 }
  0x6a   : > { %1242 = dma.done.wait (%p1762_p8), %s292_s30, 128  }
  0x6b   : > { %1244 = vsyncadd (%p1762_p8), %s292_s30, 4294967168  ;;  %s301_s12 = scalar_lea.sflag [#allocation6], %s291_s17  ;;  %s304_s13 = scalar_lea.vmem [#allocation5], %s919_s15 }
  0x6c   : > { %1246 = dma.done.wait (%p1762_p8), %s301_s12, 128  }
  0x6d   : > { %1248 = vsyncadd (%p1762_p8), %s301_s12, 4294967168  ;;  %s339_s0 = sand.u32 1, %s1263_s22   ;;  %p358_p7 = scmp.lt.s32.totalorder %s1287_s28, 1  ;;  %v366_v0 = vld [vmem:[%s295_s18] sm:$0xff]  ;;  %v367_v1 = vld [vmem:[%s304_s13] sm:$0xff] }
  0x6e   : > { %s921_s26 = sshll.u32 %s339_s0, 2  ;;  %p926_p4 = scmp.ne.s32.totalorder %s1283_s27, 0 }
  0x6f   : > { %s359_s14 = scalar_select %p358_p7, %s1287_s28, 1 }
  0x70   : > { %s1564_s15 = scalar_lea.vmem [#allocation7], %s921_s26  ;;  %s1566_s30 = scalar_lea.vmem [#allocation8], %s921_s26  ;;  %vm372_vm0 = vcmask (!%p926_p4), 3072   ;;  %vm375_vm1 = vcmask (!%p926_p4), 27648   ;;  %v1303_v2 = vmov (!%p926_p4), 0.0  }
  0x71   : > { %s924_s23 = sshll.u32 %s359_s14, 2  ;;  %s1568_s12 = scalar_lea.vmem [#allocation10], %s921_s26  ;;  %376 = vst.msk [vmem:[%s1564_s15] sm:$0xf] (!%p926_p4), %vm375_vm1, %v1303_v2  ;;  %377 = vst.msk [vmem:[%s1566_s30] sm:$0xf] (!%p926_p4), %vm375_vm1, %v1303_v2 }
  0x72   : > { %s1557_s9 = scalar_lea.vmem %s1727_s2, %s924_s23  ;;  %s1562_s17 = scalar_lea.vmem %s1728_s3, %s924_s23  ;;  %378 = vst.msk [vmem:[%s1568_s12] sm:$0xf] (!%p926_p4), %vm375_vm1, %v1303_v2 }
  0x73   : > { %371 = sbr.rel (%p926_p4) target bundleno = 122 (0x7a), region = 40  ;;  %373 = vst.msk [vmem:[%s1557_s9] sm:$0xf] (!%p926_p4), %vm372_vm0, %v1303_v2  ;;  %374 = vst.msk [vmem:[%s1562_s17] sm:$0xf] (!%p926_p4), %vm372_vm0, %v1303_v2 }
  0x7a PF: > { %v381_v3 = vcombine.high %v366_v0, %v366_v0  ;;  %v394_v4 = vcombine.high %v367_v1, %v367_v1  ;;  %vm383_vm2 = vcmask 1043456   ;;  %v379_v11 = vld [vmem:[%s1557_s9] sm:$0xf]  ;;  %vm390_vm3 = vcmask 3072   ;;  %s930_s18 = sshll.u32 %s1287_s28, 6  ;;  %s661_s13 = sshll.u32 %s1564_s15, 4  ;;  %s1592_s13 = int_to_ptr.vmem [resolvable:$true] %s661_s13 }
  0x7b   : > { %v384_v5 = vsel %vm383_vm2, %v366_v0, 0.0  ;;  %v396_v7 = vsel %vm383_vm2, %v367_v1, 0.0  ;;  %v392_v14 = vld [vmem:[%s1562_s17] sm:$0xf]  ;;  %v477_v18 = vld [vmem:[%s1566_s30] sm:$0xf]  ;;  %s1590_s20 = scalar_lea.hbm %s1729_s4, %s930_s18  ;;  %s1598_s24 = scalar_lea.hbm %s1730_s5, %s930_s18 }
  0x7c   : > { %404 = vmatprep.subr.mxu0 %v381_v3  ;;  %468 = vmatprep.mubr.f32.mxu0 %v381_v3  ;;  %v385_v6 = vsel %vm383_vm2, %v381_v3, 0.0  ;;  %v397_v8 = vsel %vm383_vm2, %v394_v4, 0.0  ;;  %v403_v17 = vld [vmem:[%s1564_s15] sm:$0xf]  ;;  %s674_s26 = sshll.u32 %s1566_s30, 4  ;;  %vm475_vm4 = vcmask 27648   ;;  %s1607_s23 = scalar_lea.hbm %s1731_s6, %s930_s18  ;;  %s1600_s26 = int_to_ptr.vmem [resolvable:$true] %s674_s26 }
  0x7d   : > { %405 = vmatpush1.xpose.msra.mxu0 %v366_v0  ;;  %478 = vmatprep.subr.mxu1 %v394_v4  ;;  %v386_v9 = vadd.f32 %v385_v6, %v384_v5  ;;  %v398_v10 = vadd.f32 %v397_v8, %v396_v7  ;;  %s687_s14 = sshll.u32 %s1568_s12, 4  ;;  %v550_v25 = vld [vmem:[%s1568_s12] sm:$0xf]  ;;  %s632_s10 = scalar_lea.sflag [#allocation4], %s339_s0  ;;  %s1609_s14 = int_to_ptr.vmem [resolvable:$true] %s687_s14 }
  0x7e   : > { %479 = vmatpush1.xpose.msra.mxu1 %v367_v1  ;;  %551 = vmatprep.subr.mxu0 %v394_v4  ;;  %s1113_s28 = scalar_lea.vmem %s1592_s13, 64  ;;  %p1763_p11 = scmp.ne.s32.totalorder %s1750_s19, 0 }
  0x7f   : > { %542 = vmatprep.mubr.f32.mxu1 %v381_v3  ;;  %387 = vadd.xlane.f32.xlu0 %v386_v9  ;;  %p1114_p10 = scmp.ne.s32.totalorder %s1592_s13, %s1113_s28 }
  0x80   : > { %469 = vmatmul.mubr.f32.vlgmr.msra.gmra.mrb[0].mxu0 %v366_v0 }
  0x81   : > { %552 = vmatpush1.xpose.msra.mxu0 %v367_v1  ;;  %543 = vmatmul.mubr.f32.vlgmr.msra.gmra.mrb[0].mxu1 %v366_v0  ;;  %p1115_p13 = pnand %p1114_p10, %p1763_p11 }
  0x82   : > { %615 = vmatprep.mubr.f32.mxu0 %v394_v4 }
  0x83   : > { %399 = vadd.xlane.f32.xlu0 %v398_v10  ;;  %p1116_p0 = pneg %p1115_p13 }
  0x84   : > { %616 = vmatmul.mubr.f32.vlgmr.msra.gmra.mrb[2].mxu0 %v367_v1 }
 0x10c   : > { %v388_v12 = vpop.xlane.xlu0 %387 }
 0x10d   : > { %v389_v13 = vadd.f32 %v388_v12, %v379_v11 }
 0x10f   : > { %391 = vst.msk [vmem:[%s1557_s9] sm:$0xf] %vm390_vm3, %v389_v13  ;;  %s1304_s9 = smov [#allocation7]  }
 0x110   : > { %v400_v15 = vpop.xlane.xlu0 %399  ;;  %s1117_s27 = sshll.u32 %s1304_s9, 4  ;;  %s1118_s27 = int_to_ptr.vmem [resolvable:$false] %s1117_s27 }
 0x111   : > { %v401_v16 = vadd.f32 %v400_v15, %v392_v14  ;;  %p1120_p5 = scmp.lt.s32.totalorder %s1592_s13, %s1118_s27 }
 0x113   : > { %402 = vst.msk [vmem:[%s1562_s17] sm:$0xf] %vm390_vm3, %v401_v16 }
 0x153   : > { %v470_v19 = vpop.f32.mrb[0].mxu0 }
 0x154   : > { %v474_v20 = vadd.f32 %v470_v19, %v403_v17  ;;  %v472_v21 = vpop.f32.mrb[1].mxu0  ;;  %v544_v22 = vpop.f32.mrb[0].mxu1 }
 0x155   : > { %v548_v23 = vadd.f32 %v544_v22, %v477_v18  ;;  %v546_v24 = vpop.f32.mrb[1].mxu1 }
 0x156   : > { %476 = vst.msk [vmem:[%s1564_s15] sm:$0xf] %vm475_vm4, %v474_v20  ;;  %s1119_s15 = scalar_lea.vmem %s1118_s27, 128 }
 0x157   : > { %v617_v26 = vpop.f32.mrb[2].mxu0  ;;  %549 = vst.msk [vmem:[%s1566_s30] sm:$0xf] %vm475_vm4, %v548_v23  ;;  %p1121_p6 = scmp.lt.s32.totalorder %s1119_s15, %s1113_s28 }
 0x159   : > { %p1122_p12 = por %p1121_p6, %p1120_p5 }
 0x15b   : > { %p1123_p2 = pnand %p1122_p12, %p1116_p0 }
 0x15d   : > { %1126 = shalt.err (!%p1123_p2)
}
 0x15e   : > { %s1127_s0 = scalar_lea.hbm %s1590_s20, 64  ;;  %s1131_s16 = scalar_lea.hbm %s1729_s4, 128 }
 0x15f   : > { %p1128_p3 = scmp.ne.s32.totalorder %s1590_s20, %s1127_s0  ;;  %p1132_p8 = scmp.lt.u32.totalorder %s1590_s20, %s1729_s4 }
 0x160   : > { %p1133_p7 = scmp.lt.u32.totalorder %s1131_s16, %s1127_s0  ;;  %p1135_p10 = scmp.lt.u32.totalorder %s1127_s0, %s1590_s20 }
 0x161   : > { %p1129_p9 = pnand %p1128_p3, %p1763_p11 }
 0x162   : > { %p1134_p4 = por %p1133_p7, %p1132_p8 }
 0x163   : > { %p1130_p1 = pneg %p1129_p9 }
 0x164   : > { %p1136_p13 = por %p1135_p10, %p1134_p4 }
 0x166   : > { %p1137_p0 = pnand %p1136_p13, %p1130_p1 }
 0x168   : > { %1140 = shalt.err (!%p1137_p0)
}
 0x169   : > { %939 = dma.vmem_to_hbm [thread:$0]  (%p1763_p11), %s1592_s13, 64, %s1590_s20, %s632_s10   ;;  %v621_v27 = vadd.f32 %v617_v26, %v550_v25  ;;  %v619_v28 = vpop.f32.mrb[3].mxu0 }
 0x16a   : > { %s1764_s28 = sand.u32 1, %s1396_s8   ;;  %s1141_s15 = scalar_lea.vmem %s1600_s26, 64 }
 0x16b   : > { %s1638_s9 = scalar_lea.sflag [#allocation9], %s1764_s28  ;;  %p1142_p5 = scmp.ne.s32.totalorder %s1600_s26, %s1141_s15 }
 0x16c   : > { %s1305_s0 = smov [#allocation8]  }
 0x16d   : > { %p1143_p6 = pnand %p1142_p5, %p1763_p11  ;;  %s1145_s30 = sshll.u32 %s1305_s0, 4  ;;  %s1146_s30 = int_to_ptr.vmem [resolvable:$false] %s1145_s30 }
 0x16e   : > { %s1147_s18 = scalar_lea.vmem %s1146_s30, 128  ;;  %p1148_p2 = scmp.lt.s32.totalorder %s1600_s26, %s1146_s30 }
 0x16f   : > { %p1144_p12 = pneg %p1143_p6  ;;  %p1149_p3 = scmp.lt.s32.totalorder %s1147_s18, %s1141_s15 }
 0x171   : > { %p1150_p9 = por %p1149_p3, %p1148_p2 }
 0x173   : > { %p1151_p1 = pnand %p1150_p9, %p1144_p12 }
 0x175   : > { %1154 = shalt.err (!%p1151_p1)
}
 0x176   : > { %s1155_s8 = scalar_lea.hbm %s1598_s24, 64  ;;  %s1159_s10 = scalar_lea.hbm %s1730_s5, 128 }
 0x177   : > { %p1156_p8 = scmp.ne.s32.totalorder %s1598_s24, %s1155_s8  ;;  %p1160_p10 = scmp.lt.u32.totalorder %s1598_s24, %s1730_s5 }
 0x178   : > { %p1161_p13 = scmp.lt.u32.totalorder %s1159_s10, %s1155_s8  ;;  %p1163_p5 = scmp.lt.u32.totalorder %s1155_s8, %s1598_s24 }
 0x179   : > { %p1157_p7 = pnand %p1156_p8, %p1763_p11 }
 0x17a   : > { %p1162_p0 = por %p1161_p13, %p1160_p10 }
 0x17b   : > { %p1158_p4 = pneg %p1157_p7 }
 0x17c   : > { %p1164_p6 = por %p1163_p5, %p1162_p0 }
 0x17e   : > { %p1165_p12 = pnand %p1164_p6, %p1158_p4 }
 0x180   : > { %1168 = shalt.err (!%p1165_p12)
}
 0x181   : > { %940 = dma.vmem_to_hbm [thread:$0]  (%p1763_p11), %s1600_s26, 64, %s1598_s24, %s1638_s9   ;;  %622 = vst.msk [vmem:[%s1568_s12] sm:$0xf] %vm475_vm4, %v621_v27 }
 0x182   : > { %s1169_s27 = scalar_lea.vmem %s1609_s14, 64  ;;  %s1306_s28 = smov [#allocation10]  }
 0x183   : > { %p1170_p2 = scmp.ne.s32.totalorder %s1609_s14, %s1169_s27  ;;  %s1173_s15 = sshll.u32 %s1306_s28, 4  ;;  %s1174_s15 = int_to_ptr.vmem [resolvable:$false] %s1173_s15 }
 0x184   : > { %s1175_s0 = scalar_lea.vmem %s1174_s15, 128  ;;  %p1176_p1 = scmp.lt.s32.totalorder %s1609_s14, %s1174_s15 }
 0x185   : > { %p1171_p3 = pnand %p1170_p2, %p1763_p11  ;;  %p1177_p8 = scmp.lt.s32.totalorder %s1175_s0, %s1169_s27 }
 0x187   : > { %p1172_p9 = pneg %p1171_p3  ;;  %p1178_p7 = por %p1177_p8, %p1176_p1 }
 0x189   : > { %p1179_p4 = pnand %p1178_p7, %p1172_p9 }
 0x18b   : > { %1182 = shalt.err (!%p1179_p4)
}
 0x18c   : > { %s1183_s12 = scalar_lea.hbm %s1607_s23, 64  ;;  %s1187_s30 = scalar_lea.hbm %s1731_s6, 128 }
 0x18d   : > { %p1184_p10 = scmp.ne.s32.totalorder %s1607_s23, %s1183_s12  ;;  %p1188_p5 = scmp.lt.u32.totalorder %s1607_s23, %s1731_s6 }
 0x18e   : > { %p1189_p6 = scmp.lt.u32.totalorder %s1187_s30, %s1183_s12  ;;  %p1191_p2 = scmp.lt.u32.totalorder %s1183_s12, %s1607_s23 }
 0x18f   : > { %p1185_p13 = pnand %p1184_p10, %p1763_p11 }
 0x190   : > { %p1190_p12 = por %p1189_p6, %p1188_p5 }
 0x191   : > { %p1186_p0 = pneg %p1185_p13 }
 0x192   : > { %p1192_p3 = por %p1191_p2, %p1190_p12 }
 0x194   : > { %p1193_p9 = pnand %p1192_p3, %p1186_p0 }
 0x196   : > { %1196 = shalt.err (!%p1193_p9)
}
 0x197   : > { %941 = dma.vmem_to_hbm [thread:$0]  (%p1763_p11), %s1609_s14, 64, %s1607_s23, %s1638_s9  }
 0x198 PF: > { %p963_p1 = scmp.ge.s32.totalorder %s1299_s7, 2  ;;  %s713_s13 = sand.u32 1, %s1259_s21  }
 0x199   : > { %p1765_p8 = scmp.ne.s32.totalorder %s1753_s11, 0  ;;  %s714_s20 = scalar_lea.sflag [#allocation4], %s713_s13 }
 0x19b   : > { %p953_p7 = pnand %p963_p1, %p1765_p8 }
 0x19d   : > { %1250 = dma.done.wait (!%p953_p7), %s714_s20, 64  }
 0x19e   : > { %1252 = vsyncadd (!%p953_p7), %s714_s20, 4294967232  ;;  %s1766_s10 = sadd.s32 4294967294, %s1299_s7  }
 0x19f   : > { %s722_s16 = sand.u32 1, %s1766_s10  }
 0x1a0   : > { %s723_s17 = scalar_lea.sflag [#allocation9], %s722_s16 }
 0x1a1   : > { %1254 = dma.done.wait (!%p953_p7), %s723_s17, 128  }
 0x1a2   : > { %1256 = vsyncadd (!%p953_p7), %s723_s17, 4294967168  ;;  %s29_s7 = sadd.s32 1, %s1299_s7   ;;  %s1767_s19 = sld [smem:[#allocation15_spill]] }
 0x1a3   : > { %p26_p11 = scmp.ge.s32.totalorder %s29_s7, 10   ;;  %s1768_s23 = sld [smem:[#allocation20_spill]] }
 0x1a4   : > { %s1769_s14 = sld [smem:[#allocation16_spill]]  ;;  %s1770_s26 = sld [smem:[#allocation21_spill]] }
 0x1a5   : > { %s1771_s28 = sld [smem:[#allocation17_spill]]  ;;  %s1772_s11 = sld [smem:[#allocation18_spill]] }
 0x1a6   : > { %s1773_s30 = sld [smem:[#allocation19_spill]]  ;;  %s1774_s21 = smov %s1263_s22 }
 0x1a7   : > { %s1776_s24 = smov %s1275_s25  ;;  %s1778_s27 = smov %s1291_s29 }
 0x1a8   : > { %s1775_s22 = smov %s1767_s19  ;;  %28 = sbr.rel (!%p26_p11) target bundleno = 15 (0xf), region = 146 }
 0x1aa   : > { %s1777_s25 = smov %s1769_s14 }
 0x1ab   : > { %s1779_s29 = smov %s1772_s11 }
 0x1af   :  { %737 = vsyncpa [#allocation3], 1 }
 0x1b0   :  { %739 = vsyncpa [#allocation3 + $0x1], 1 }
 0x1b1   :  { %740 = vsyncpa [#allocation6], 1 }
 0x1b2   :  { %742 = vsyncpa [#allocation6 + $0x1], 1 }
 0x1b3   :  { %743 = vsyncpa [#allocation4], 1 }
 0x1b4   :  { %745 = vsyncpa [#allocation4 + $0x1], 1 }
 0x1b5   :  { %746 = vsyncpa [#allocation9], 1 }
 0x1b6   :  { %748 = vsyncpa [#allocation9 + $0x1], 1 }

</bundles_post_ra>
